<compile_context>
chip_gen: v5e
topology: v5e:2x2
jax: 0.10.0
libtpu: 0.0.40
codegen_flags: <defaults>
</compile_context>

<pallas_src>
import jax
import jax.numpy as jnp
from jax.experimental import pallas as pl
from jax.experimental.pallas import tpu as pltpu

_NEG_PAD = -1e4  # exp(-1e4) underflows to 0 -> padded-element loss is exactly 0.0


def _bce_partial_kernel(x_ref, t_ref, out_ref):
    """Per-tile partial BCE-with-logits sums.

    x_ref, t_ref: (bm, Cpad) VMEM tiles (any float dtype; upcast to f32 here).
    out_ref:      (8, Cpad) lane-dense partial sums for this tile.
    Padded rows/cols were filled with (x=-1e4, t=0) in the wrapper so they
    contribute exactly 0 -> no in-kernel masking needed.
    """
    x = x_ref[...].astype(jnp.float32)
    t = t_ref[...].astype(jnp.float32)

    # Numerically stable BCE with logits:
    #   loss = max(x, 0) - x * t + log1p(exp(-|x|))
    loss = jnp.maximum(x, 0.0) - x * t + jnp.log1p(jnp.exp(-jnp.abs(x)))

    # (bm, Cpad) -> (bm//8, 8, Cpad), sum over the leading groups: pure element-wise
    # vreg adds (VPU only, no cross-lane/sublane reduce). Final scalar reduce is done
    # in the wrapper on the tiny (num_tiles*8, Cpad) partials array.
    bm, cpad = loss.shape
    out_ref[...] = jnp.sum(loss.reshape(bm // 8, 8, cpad), axis=0)


def bce_with_logits_loss(inputs, targets, *, reduction="mean"):
    """Pallas equivalent of F.binary_cross_entropy_with_logits(inputs, targets).

    Accepts f32 or bf16 inputs/targets (memory-bound kernel: narrower inputs halve
    HBM traffic); accumulation is always f32.
    """
    assert inputs.shape == targets.shape
    B, C = inputs.shape

    # ---- tiling ----------------------------------------------------------
    Cpad = ((C + 127) // 128) * 128
    in_bytes = jnp.dtype(inputs.dtype).itemsize + jnp.dtype(targets.dtype).itemsize

    # Size the batch tile from a conservative double-buffered VMEM budget (~16 MiB
    # of live input blocks). This is well past the HBM-roofline knee on v5e/v6e/v7x
    # and leaves ample headroom on v7x's 64 MiB VMEM (cap at 1024 rows).
    VMEM_INPUT_BUDGET = 16 * 1024 * 1024
    bm = VMEM_INPUT_BUDGET // (2 * Cpad * in_bytes)  # 2x for double buffering
    bm = max(8, min(1024, (bm // 8) * 8))
    bm = min(bm, ((B + 7) // 8) * 8)                 # don't over-pad tiny batches

    Bpad = ((B + bm - 1) // bm) * bm
    num_tiles = Bpad // bm

    # ---- padding (values chosen so padded elements give exactly zero loss) ----
    row_pad, col_pad = Bpad - B, Cpad - C
    if row_pad or col_pad:
        pad = ((0, row_pad), (0, col_pad))
        inputs_p = jnp.pad(inputs, pad, constant_values=_NEG_PAD)
        targets_p = jnp.pad(targets, pad, constant_values=0)
    else:
        inputs_p, targets_p = inputs, targets

    # ---- pallas call -----------------------------------------------------
    footprint = 2 * bm * Cpad * in_bytes + 2 * 8 * Cpad * 4  # double-buffered in/out
    vmem_limit = int(min(48 << 20, max(32 << 20, footprint + (8 << 20))))

    partials = pl.pallas_call(
        _bce_partial_kernel,
        out_shape=jax.ShapeDtypeStruct((num_tiles * 8, Cpad), jnp.float32),
        grid_spec=pltpu.PrefetchScalarGridSpec(
            num_scalar_prefetch=0,
            grid=(num_tiles,),
            in_specs=[
                pl.BlockSpec((bm, Cpad), lambda i: (i, 0)),
                pl.BlockSpec((bm, Cpad), lambda i: (i, 0)),
            ],
            out_specs=pl.BlockSpec((8, Cpad), lambda i: (i, 0)),
        ),
        compiler_params=pltpu.CompilerParams(
            dimension_semantics=("parallel",),   # independent per-tile partials
            vmem_limit_bytes=vmem_limit,
        ),
    )(inputs_p, targets_p)

    total = jnp.sum(partials)  # padded rows/cols contribute exactly 0
    if reduction == "mean":
        return total / jnp.float32(B * C)
    elif reduction == "sum":
        return total
    else:
        raise NotImplementedError(reduction)
    # TODO(synk): reduction='none' would need the full (B, C) loss as the output.


class BCELoss:
    """JAX/Pallas port of the PyTorch BCELoss module (logits=True path)."""

    def __init__(self, logits=True, reduction="mean"):
        # TODO(synk): logits=False (BCE on probabilities) path not implemented.
        assert logits, "Only the logits=True path is implemented in the kernel."
        self.reduction = reduction

    def __call__(self, inputs, targets):
        return bce_with_logits_loss(inputs, targets, reduction=self.reduction)


if __name__ == "__main__":
    key = jax.random.PRNGKey(0)
    k1, k2 = jax.random.split(key)

    B, C = 2, 1004  # matches the module docstring: (batch_size, 1004)
    logits = jax.random.normal(k1, (B, C), dtype=jnp.float32)
    targets = (jax.random.uniform(k2, (B, C)) > 0.5).astype(jnp.float32)

    loss_fn = BCELoss(logits=True, reduction="mean")
    loss = loss_fn(logits, targets)
    jax.block_until_ready(loss)

    # Reference check in plain JAX (same stable formula).
    ref = jnp.mean(
        jnp.maximum(logits, 0.0)
        - logits * targets
        + jnp.log1p(jnp.exp(-jnp.abs(logits)))
    )
    assert jnp.allclose(loss, ref, atol=1e-5, rtol=1e-5), (loss, ref)

    print("KERNEL_OK")
</pallas_src>

<mosaic_0001>
module attributes {stable_mosaic.version = 11 : i64} {
  func.func @_bce_partial_kernel(%arg0: i32, %arg1: memref<8x1024xf32, #tpu.memory_space<vmem>>, %arg2: memref<8x1024xf32, #tpu.memory_space<vmem>>, %arg3: memref<8x1024xf32, #tpu.memory_space<vmem>>) attributes {dimension_semantics = [#tpu.dimension_semantics<parallel>], iteration_bounds = array<i64: 1>, scalar_prefetch = 0 : i64, scratch_operands = 0 : i64, tpu.core_type = #tpu.core_type<tc>, window_params = [{transform_indices = @transform_0, window_bounds = array<i64: 8, 1024>}, {transform_indices = @transform_1, window_bounds = array<i64: 8, 1024>}, {transform_indices = @transform_2, window_bounds = array<i64: 8, 1024>}]} {
    %c0 = arith.constant 0 : index
    %c0_0 = arith.constant 0 : index
    %0 = vector.load %arg1[%c0, %c0_0] : memref<8x1024xf32, #tpu.memory_space<vmem>>, vector<8x1024xf32>
    %c0_1 = arith.constant 0 : index
    %c0_2 = arith.constant 0 : index
    %1 = vector.load %arg2[%c0_1, %c0_2] : memref<8x1024xf32, #tpu.memory_space<vmem>>, vector<8x1024xf32>
    %cst = arith.constant 0.000000e+00 : f32
    %2 = vector.broadcast %cst : f32 to vector<8x1024xf32>
    %3 = arith.maximumf %0, %2 : vector<8x1024xf32>
    %4 = arith.mulf %0, %1 : vector<8x1024xf32>
    %5 = arith.subf %3, %4 : vector<8x1024xf32>
    %6 = math.absf %0 : vector<8x1024xf32>
    %cst_3 = arith.constant 0.000000e+00 : f32
    %7 = vector.broadcast %cst_3 : f32 to vector<8x1024xf32>
    %8 = arith.subf %7, %6 : vector<8x1024xf32>
    %9 = math.exp %8 : vector<8x1024xf32>
    %10 = math.log1p %9 : vector<8x1024xf32>
    %11 = arith.addf %5, %10 : vector<8x1024xf32>
    %12 = vector.shape_cast %11 : vector<8x1024xf32> to vector<1x8x1024xf32>
    %cst_4 = arith.constant dense<0.000000e+00> : vector<8x1024xf32>
    %13 = vector.multi_reduction <add>, %12, %cst_4 [0] : vector<1x8x1024xf32> to vector<8x1024xf32>
    %c0_5 = arith.constant 0 : index
    %c0_6 = arith.constant 0 : index
    %14 = vector.load %arg3[%c0_5, %c0_6] : memref<8x1024xf32, #tpu.memory_space<vmem>>, vector<8x1024xf32>
    tpu.vector_store %arg3[%c0_5, %c0_6], %13 {strides = array<i32>} : memref<8x1024xf32, #tpu.memory_space<vmem>>, vector<8x1024xf32>,
    return
  }
  func.func @transform_0(%arg0: i32) -> (i32, i32) {
    %c0_i32 = arith.constant 0 : i32
    %c0_i32_0 = arith.constant 0 : i32
    return %arg0, %c0_i32 : i32, i32
  }
  func.func @transform_1(%arg0: i32) -> (i32, i32) {
    %c0_i32 = arith.constant 0 : i32
    %c0_i32_0 = arith.constant 0 : i32
    return %arg0, %c0_i32 : i32, i32
  }
  func.func @transform_2(%arg0: i32) -> (i32, i32) {
    %c0_i32 = arith.constant 0 : i32
    %c0_i32_0 = arith.constant 0 : i32
    return %arg0, %c0_i32 : i32, i32
  }
}

</mosaic_0001>

<bundles_post_ra>
// kernel: tpu_custom_call.1
= control target key start
LH: loop header
LB: loop body
LE: loop exit
PB: predicated region body
PF: predicated region fallthrough
CT: control target
= control target key end

     0   :  { %7 = vsyncpa [#allocation3], 0  ;;  %s438_s0 = inlined_call_operand.hbm [shape: f32[8,1024], index: 0, kind: input, shape index: {}]   ;;  %s439_s1 = inlined_call_operand.hbm [shape: f32[8,1024], index: 1, kind: input, shape index: {}]   ;;  %s440_s2 = inlined_call_operand.hbm [shape: f32[8,1024], index: 2, kind: output, shape index: {}]  }
   0x1   :  { %8 = vsyncpa [#allocation6], 0 }
   0x2   :  { %9 = vsyncpa [#allocation4], 0  ;;  %s15_s11 = sshll.u32 %s438_s0, 4  ;;  %s339_s12 = smov [#allocation2]   ;;  %s16_s11 = int_to_ptr.hbm [resolvable:$true] %s15_s11 }
   0x3   :  { %s17_s13 = sshll.u32 %s339_s12, 4  ;;  %s26_s16 = sshll.u32 %s439_s1, 4  ;;  %s18_s13 = int_to_ptr.vmem [resolvable:$true] %s17_s13  ;;  %s27_s16 = int_to_ptr.hbm [resolvable:$true] %s26_s16 }
   0x4   :  { %20 = dma.hbm_to_vmem [thread:$0]  %s16_s11, 1024, %s18_s13, [#allocation3]  }
   0x5   :  { %s340_s17 = smov [#allocation5]  }
   0x6   :  { %s28_s18 = sshll.u32 %s340_s17, 4  ;;  %s29_s18 = int_to_ptr.vmem [resolvable:$true] %s28_s18 }
   0x7   :  { %31 = dma.hbm_to_vmem [thread:$0]  %s27_s16, 1024, %s29_s18, [#allocation6]  }
   0x8   :  { %333 = dma.done.wait [#allocation3], 1024  }
   0x9   :  { %334 = vsyncadd [#allocation3], 4294966272 }
   0xa   :  { %335 = dma.done.wait [#allocation6], 1024  }
   0xb   :  { %336 = vsyncadd [#allocation6], 4294966272  ;;  %v40_v0 = vld [vmem:[#allocation2] sm:$0xff]  ;;  %v41_v1 = vld [vmem:[#allocation2 + $0x8] sm:$0xff]  ;;  %s341_s0 = smov [#allocation7]   ;;  %s215_s21 = sshll.u32 %s440_s2, 4  ;;  %s216_s21 = int_to_ptr.hbm [resolvable:$true] %s215_s21 }
   0xc   :  { %v80_v2 = vand.u32 2147483647, %v40_v0  ;;  %v42_v3 = vld [vmem:[#allocation2 + $0x10] sm:$0xff]  ;;  %v48_v4 = vld [vmem:[#allocation5] sm:$0xff]  ;;  %v81_v5 = vand.u32 2147483647, %v41_v1 }
   0xd   :  { %v82_v6 = vand.u32 2147483647, %v42_v3  ;;  %v49_v8 = vld [vmem:[#allocation5 + $0x8] sm:$0xff]  ;;  %v43_v9 = vld [vmem:[#allocation2 + $0x18] sm:$0xff]  ;;  %v56_v10 = vmax.f32 %v40_v0, 0.0  ;;  %v363_v13 = vld [vmem:[#allocation2 + $0x20] sm:$0xff]  ;;  %v64_v14 = vmul.f32 %v48_v4, %v40_v0 }
   0xe   :  { %v88_v7 = vsub.f32 0.0, %v80_v2  ;;  %v89_v11 = vsub.f32 0.0, %v81_v5  ;;  %v50_v16 = vld [vmem:[#allocation5 + $0x10] sm:$0xff]  ;;  %v51_v17 = vld [vmem:[#allocation5 + $0x18] sm:$0xff]  ;;  %v83_v18 = vand.u32 2147483647, %v43_v9  ;;  %v65_v20 = vmul.f32 %v49_v8, %v41_v1 }
   0xf   :  { %v90_v12 = vsub.f32 0.0, %v82_v6  ;;  %v57_v19 = vmax.f32 %v41_v1, 0.0  ;;  %v365_v23 = vld [vmem:[#allocation2 + $0x28] sm:$0xff]  ;;  %v58_v24 = vmax.f32 %v42_v3, 0.0  ;;  %v84_v26 = vand.u32 2147483647, %v363_v13 }
  0x10   :  { %v96_v15 = vmul.f32 1.442695, %v88_v7  ;;  %v98_v21 = vmul.f32 1.442695, %v89_v11  ;;  %v91_v25 = vsub.f32 0.0, %v83_v18  ;;  %v368_v27 = vld [vmem:[#allocation2 + $0x30] sm:$0xff]  ;;  %v66_v28 = vmul.f32 %v50_v16, %v42_v3 }
  0x11   :  { %v100_v22 = vmul.f32 1.442695, %v90_v12  ;;  %v59_v29 = vmax.f32 %v43_v9, 0.0  ;;  %v67_v30 = vmul.f32 %v51_v17, %v43_v9  ;;  %v92_v32 = vsub.f32 0.0, %v84_v26  ;;  %v52_v34 = vld [vmem:[#allocation5 + $0x20] sm:$0xff]  ;;  %v53_v42 = vld [vmem:[#allocation5 + $0x28] sm:$0xff] }
  0x12   :  { %229 = vpow2.f32 %v96_v15  ;;  %v102_v31 = vmul.f32 1.442695, %v91_v25  ;;  %v85_v33 = vand.u32 2147483647, %v365_v23  ;;  %v86_v35 = vand.u32 2147483647, %v368_v27 }
  0x13   :  { %231 = vpow2.f32 %v98_v21  ;;  %v104_v36 = vmul.f32 1.442695, %v92_v32  ;;  %v372_v38 = vsub.f32 %v56_v10, %v64_v14  ;;  %v374_v39 = vsub.f32 %v57_v19, %v65_v20  ;;  %v388_v56 = vld [vmem:[#allocation2 + $0x38] sm:$0xff]  ;;  %s213_s1 = sshll.u32 %s341_s0, 4  ;;  %s214_s1 = int_to_ptr.vmem [resolvable:$true] %s213_s1 }
  0x14   :  { %233 = vpow2.f32 %v100_v22  ;;  %v93_v37 = vsub.f32 0.0, %v85_v33  ;;  %v376_v40 = vsub.f32 %v58_v24, %v66_v28  ;;  %v60_v41 = vmax.f32 %v363_v13, 0.0 }
  0x15   :  { %235 = vpow2.f32 %v102_v31  ;;  %v379_v44 = vsub.f32 %v59_v29, %v67_v30  ;;  %v382_v45 = vmul.f32 %v52_v34, %v363_v13  ;;  %v61_v50 = vmax.f32 %v365_v23, 0.0 }
  0x16   :  { %237 = vpow2.f32 %v104_v36  ;;  %v106_v46 = vmul.f32 1.442695, %v93_v37  ;;  %v94_v51 = vsub.f32 0.0, %v86_v35  ;;  %v386_v55 = vmul.f32 %v53_v42, %v365_v23 }
  0x17   :  { %v87_v2 = vand.u32 2147483647, %v388_v56  ;;  %v62_v23 = vmax.f32 %v368_v27, 0.0 }
  0x18   :  { %v230_v43 = vpop.eup %229  ;;  %239 = vpow2.f32 %v106_v46  ;;  %v108_v1 = vmul.f32 1.442695, %v94_v51  ;;  %v77_v13 = vsub.f32 %v61_v50, %v386_v55 }
  0x19   :  { %v232_v47 = vpop.eup %231  ;;  %v112_v48 = vadd.f32 1.0, %v230_v43  ;;  %v115_v49 = vmul.f32 -0.5, %v230_v43  ;;  %v118_v57 = vand.u32 2147483647, %v230_v43 }
  0x1a   :  { %v234_v52 = vpop.eup %233  ;;  %v121_v53 = vadd.f32 1.0, %v232_v47  ;;  %v124_v54 = vmul.f32 -0.5, %v232_v47  ;;  %v127_v58 = vand.u32 2147483647, %v232_v47 }
  0x1b   :  { %241 = vlog2.f32 %v112_v48  ;;  %v130_v59 = vadd.f32 1.0, %v234_v52  ;;  %v236_v60 = vpop.eup %235  ;;  %v116_v61 = vadd.f32 1.0, %v115_v49  ;;  %v133_v63 = vmul.f32 -0.5, %v234_v52 }
  0x1c   :  { %243 = vlog2.f32 %v121_v53  ;;  %v125_v62 = vadd.f32 1.0, %v124_v54  ;;  %v139_v0 = vadd.f32 1.0, %v236_v60  ;;  %v238_v3 = vpop.eup %237  ;;  %v136_v5 = vand.u32 2147483647, %v234_v52 }
  0x1d   :  { %245 = vlog2.f32 %v130_v59  ;;  %v134_v4 = vadd.f32 1.0, %v133_v63  ;;  %v142_v6 = vmul.f32 -0.5, %v236_v60  ;;  %v145_v7 = vand.u32 2147483647, %v236_v60 }
  0x1e   :  { %vm391_vm0 = vcmp.lt.f32.partialorder %v118_v57, 0.0004427343  ;;  %247 = vlog2.f32 %v139_v0  ;;  %v148_v9 = vadd.f32 1.0, %v238_v3  ;;  %v151_v10 = vmul.f32 -0.5, %v238_v3  ;;  %v240_v11 = vpop.eup %239 }
  0x1f   :  { %v117_v12 = vmul.f32 %v230_v43, %v116_v61  ;;  %v126_v14 = vmul.f32 %v232_v47, %v125_v62  ;;  %vm395_vm1 = vcmp.lt.f32.partialorder %v127_v58, 0.0004427343  ;;  %v143_v16 = vadd.f32 1.0, %v142_v6 }
  0x20   :  { %249 = vlog2.f32 %v148_v9  ;;  %v152_v18 = vadd.f32 1.0, %v151_v10  ;;  %v157_v19 = vadd.f32 1.0, %v240_v11  ;;  %v160_v20 = vmul.f32 -0.5, %v240_v11 }
  0x21   :  { %v242_v17 = vpop.eup %241  ;;  %v135_v24 = vmul.f32 %v234_v52, %v134_v4  ;;  %vm399_vm2 = vcmp.lt.f32.partialorder %v136_v5, 0.0004427343  ;;  %vm403_vm3 = vcmp.lt.f32.partialorder %v145_v7, 0.0004427343  ;;  %v144_v30 = vmul.f32 %v236_v60, %v143_v16  ;;  %v55_v7 = vld [vmem:[#allocation5 + $0x38] sm:$0xff] }
  0x22   :  { %v244_v21 = vpop.eup %243  ;;  %v114_v22 = vmul.f32 0.6931472, %v242_v17  ;;  %v154_v31 = vand.u32 2147483647, %v238_v3  ;;  %251 = vlog2.f32 %v157_v19  ;;  %v161_v34 = vadd.f32 1.0, %v160_v20 }
  0x23   :  { %v246_v28 = vpop.eup %245  ;;  %v123_v29 = vmul.f32 0.6931472, %v244_v21  ;;  %253 = vpow2.f32 %v108_v1  ;;  %v153_v42 = vmul.f32 %v238_v3, %v152_v18  ;;  %v163_v43 = vand.u32 2147483647, %v240_v11  ;;  %v54_v1 = vld [vmem:[#allocation5 + $0x30] sm:$0xff] }
  0x24   :  { %v120_v32 = vsel %vm391_vm0, %v117_v12, %v114_v22  ;;  %v132_v33 = vmul.f32 0.6931472, %v246_v28  ;;  %v248_v35 = vpop.eup %247  ;;  %v95_v49 = vsub.f32 0.0, %v87_v2  ;;  %vm419_vm4 = vcmp.lt.f32.partialorder %v154_v31, 0.0004427343 }
  0x25   :  { %v184_v36 = vadd.f32 %v120_v32, %v372_v38  ;;  %v129_v37 = vsel %vm395_vm1, %v126_v14, %v123_v29  ;;  %v141_v48 = vmul.f32 0.6931472, %v248_v35  ;;  %v76_v38 = vsub.f32 %v60_v41, %v382_v45 }
  0x26   :  { %v185_v46 = vadd.f32 %v129_v37, %v374_v39  ;;  %v138_v47 = vsel %vm399_vm2, %v135_v24, %v132_v33  ;;  %v250_v51 = vpop.eup %249  ;;  %v162_v57 = vmul.f32 %v240_v11, %v161_v34  ;;  %v110_v58 = vmul.f32 1.442695, %v95_v49 }
  0x27   :  { %200 = vst [vmem:[#allocation7] sm:$0xff] %v184_v36  ;;  %v186_v52 = vadd.f32 %v138_v47, %v376_v40  ;;  %v147_v39 = vsel %vm403_vm3, %v144_v30, %v141_v48  ;;  %v150_v54 = vmul.f32 0.6931472, %v250_v51  ;;  %vm164_vm5 = vcmp.lt.f32.partialorder %v163_v43, 0.0004427343 }
  0x28   :  { %201 = vst [vmem:[#allocation7 + $0x8] sm:$0xff] %v185_v46  ;;  %v252_v59 = vpop.eup %251  ;;  %v187_v60 = vadd.f32 %v147_v39, %v379_v44  ;;  %255 = vpow2.f32 %v110_v58  ;;  %v70_v50 = vmul.f32 %v54_v1, %v368_v27  ;;  %v63_v12 = vmax.f32 %v388_v56, 0.0 }
  0x29   :  { %202 = vst [vmem:[#allocation7 + $0x10] sm:$0xff] %v186_v52  ;;  %v254_v40 = vpop.eup %253  ;;  %v156_v41 = vsel %vm419_vm4, %v153_v42, %v150_v54  ;;  %v159_v45 = vmul.f32 0.6931472, %v252_v59  ;;  %v71_v14 = vmul.f32 %v55_v7, %v388_v56 }
  0x2a   :  { %203 = vst [vmem:[#allocation7 + $0x18] sm:$0xff] %v187_v60  ;;  %v188_v61 = vadd.f32 %v156_v41, %v76_v38  ;;  %v166_v62 = vadd.f32 1.0, %v254_v40  ;;  %v169_v63 = vmul.f32 -0.5, %v254_v40  ;;  %v172_v55 = vand.u32 2147483647, %v254_v40 }
  0x2b   :  { %v165_v0 = vsel %vm164_vm5, %v162_v57, %v159_v45  ;;  %v78_v9 = vsub.f32 %v62_v23, %v70_v50  ;;  %v79_v19 = vsub.f32 %v63_v12, %v71_v14 }
  0x2c   :  { %204 = vst [vmem:[#allocation7 + $0x20] sm:$0xff] %v188_v61  ;;  %v189_v2 = vadd.f32 %v165_v0, %v77_v13  ;;  %257 = vlog2.f32 %v166_v62  ;;  %v170_v44 = vadd.f32 1.0, %v169_v63  ;;  %vm173_vm6 = vcmp.lt.f32.partialorder %v172_v55, 0.0004427343 }
  0x2e   :  { %205 = vst [vmem:[#allocation7 + $0x28] sm:$0xff] %v189_v2  ;;  %v256_v3 = vpop.eup %255  ;;  %v171_v6 = vmul.f32 %v254_v40, %v170_v44 }
  0x2f   :  { %v175_v4 = vadd.f32 1.0, %v256_v3  ;;  %v178_v5 = vmul.f32 -0.5, %v256_v3  ;;  %v181_v15 = vand.u32 2147483647, %v256_v3 }
  0x31   :  { %259 = vlog2.f32 %v175_v4  ;;  %v179_v11 = vadd.f32 1.0, %v178_v5  ;;  %vm182_vm7 = vcmp.lt.f32.partialorder %v181_v15, 0.0004427343 }
  0x32   :  { %v258_v8 = vpop.eup %257 }
  0x33   :  { %v168_v10 = vmul.f32 0.6931472, %v258_v8  ;;  %v180_v27 = vmul.f32 %v256_v3, %v179_v11 }
  0x35   :  { %v174_v16 = vsel %vm173_vm6, %v171_v6, %v168_v10 }
  0x36   :  { %v190_v17 = vadd.f32 %v174_v16, %v78_v9 }
  0x37   :  { %v260_v18 = vpop.eup %259 }
  0x38   :  { %206 = vst [vmem:[#allocation7 + $0x30] sm:$0xff] %v190_v17  ;;  %v177_v20 = vmul.f32 0.6931472, %v260_v18 }
  0x3a   :  { %v183_v21 = vsel %vm182_vm7, %v180_v27, %v177_v20 }
  0x3b   :  { %v191_v22 = vadd.f32 %v183_v21, %v79_v19 }
  0x3d   :  { %207 = vst [vmem:[#allocation7 + $0x38] sm:$0xff] %v191_v22 }
  0x3e   :  { %218 = dma.vmem_to_hbm [thread:$0]  %s214_s1, 1024, %s216_s21, [#allocation4]  }
  0x3f   :  { %337 = dma.done.wait [#allocation4], 1024  }
  0x40   :  { %338 = vsyncadd [#allocation4], 4294966272 }
  0x41   :  { %223 = vsyncpa [#allocation3], 1 }
  0x42   :  { %224 = vsyncpa [#allocation6], 1 }
  0x43   :  { %225 = vsyncpa [#allocation4], 1 }

</bundles_post_ra>
